<compile_context>
chip_gen: v6e
topology: v6e:2x2x1
jax: 0.10.0
libtpu: 0.0.40
codegen_flags: <defaults>
</compile_context>

<pallas_src>
import functools

import jax
import jax.numpy as jnp
from jax import lax
from jax.experimental import pallas as pl
from jax.experimental.pallas import tpu as pltpu


_VMEM_BUDGET = 40 * 1024 * 1024     # per-block resident budget (fits v7x 64 MiB VMEM)
_MLP_MXU_MIN_ROWS = 64              # channel MLP goes to the MXU at >= this many rows
_BANDED_MAX_L = 256                 # banded spatial conv only while O(L^2) is cheap


def _mean_over_l(w_bl, t_blc):
    """out[b, c] = sum_l w[b, l] * t[b, l, c] — one batched MXU contraction."""
    return lax.dot_general(
        w_bl[:, None, :], t_blc,
        dimension_numbers=(((2,), (1,)), ((0,), (0,))),
        preferred_element_type=jnp.float32)[:, 0, :]


# ----------------------------------------------------------------------------
# Pallas kernel: whole CBAM forward for one batch-block per grid step
# ----------------------------------------------------------------------------
def _cbam_kernel(x_ref, w1_ref, w2t_ref, sp_ref, wfc_ref, bfc_ref, out_ref, *,
                 mlp_on_mxu, spatial_banded, fc_on_vpu):
    # x_ref  : (bb, L, C)  VMEM  batch block in its native dtype (upcast below)
    # w1_ref : (C, Cr) [MXU path] or (Cr, C) [VPU path]   ChannelAttention fc[0]
    # w2t_ref: (Cr, C)                                    ChannelAttention fc[2].T
    # sp_ref : (2L, L) VMEM banded conv matrix  OR  (2K,) SMEM tap weights
    # wfc_ref: (1, C) [OUT==1 VPU path] or (C, OUT) [MXU path]  final Linear
    # bfc_ref: (1, OUT)
    # out_ref: (bb, OUT)
    bb, L, C = x_ref.shape
    inv_l = 1.0 / L
    x = x_ref[...].astype(jnp.float32)                    # in-kernel upcast (v5e-safe)

    # ---------------- Channel attention ----------------
    # avg-over-L on the MXU (ones/L contraction), max-over-L on the XLU.
    avg_c = _mean_over_l(jnp.full((bb, L), inv_l, jnp.float32), x)     # (bb, C)
    max_c = jnp.max(x, axis=1)                                         # (bb, C)
    stacked = jnp.concatenate([avg_c, max_c], axis=0)                  # (2bb, C)
    if mlp_on_mxu:
        h = jnp.maximum(jnp.dot(stacked, w1_ref[...],
                                preferred_element_type=jnp.float32), 0.0)     # (2bb, Cr)
        mlp = jnp.dot(h, w2t_ref[...], preferred_element_type=jnp.float32)    # (2bb, C)
    else:
        # Tiny row count: broadcast-multiply + reduce on VPU/XLU, avoiding two
        # MXU fill/drain round trips on degenerate (few-row) matmuls.
        h = jnp.maximum(
            jnp.sum(stacked[:, None, :] * w1_ref[...][None, :, :], axis=-1), 0.0)  # (2bb, Cr)
        mlp = jnp.sum(h[:, :, None] * w2t_ref[...][None, :, :], axis=1)            # (2bb, C)
    ca = jax.nn.sigmoid(mlp[:bb] + mlp[bb:])                           # (bb, C)
    x_ca = x * ca[:, None, :]                                          # (bb, L, C)

    # ---------------- Spatial attention ----------------
    avg_s = jnp.mean(x_ca, axis=2)                                     # (bb, L)  lane reduce
    max_s = jnp.max(x_ca, axis=2)                                      # (bb, L)
    if spatial_banded:
        # Small L: K-tap conv as one contraction against a banded (2L, L) matrix.
        s_cat = jnp.concatenate([avg_s, max_s], axis=1)                # (bb, 2L)
        conv = jnp.dot(s_cat, sp_ref[...], preferred_element_type=jnp.float32)   # (bb, L)
    else:
        # Large L: O(L*K) tap path — zero-pad + K static slices, SMEM tap scalars.
        # (A pltpu.roll-based variant would keep the shifts on the XLU slot.)
        K = sp_ref.shape[0] // 2
        pad = (K - 1) // 2
        if pad > 0:
            zp = jnp.zeros((bb, pad), jnp.float32)
            avg_p = jnp.concatenate([zp, avg_s, zp], axis=1)           # (bb, L+K-1)
            max_p = jnp.concatenate([zp, max_s, zp], axis=1)
        else:
            avg_p, max_p = avg_s, max_s
        conv = jnp.zeros((bb, L), jnp.float32)
        for k in range(K):                                             # static unroll, K small
            conv = conv + sp_ref[k] * avg_p[:, k:k + L] \
                        + sp_ref[K + k] * max_p[:, k:k + L]
    sa = jax.nn.sigmoid(conv)                                          # (bb, L)

    # ----- gate + mean pool over L (one MXU contraction) + ReLU + Linear -----
    pooled = _mean_over_l(sa * inv_l, x_ca)                            # (bb, C), no x_sa temp
    hfc = jnp.maximum(pooled, 0.0)
    if fc_on_vpu:
        # OUT == 1: VPU multiply + lane reduce; skip a degenerate 1-column matvec.
        out = jnp.sum(hfc * wfc_ref[...], axis=-1, keepdims=True) + bfc_ref[...]
    else:
        out = jnp.dot(hfc, wfc_ref[...], preferred_element_type=jnp.float32) + bfc_ref[...]
    out_ref[...] = out.astype(out_ref.dtype)


# ----------------------------------------------------------------------------
# Batch-block policy
# ----------------------------------------------------------------------------
def _auto_batch_block(B, L, C, itemsize, banded):
    """Largest divisor of B whose per-block VMEM working set fits the budget.

    bb == B (single grid step) whenever it fits; split only for very large
    batches, and then prefer sublane-aligned (multiple-of-8) blocks."""
    def resident(bb):
        r = bb * L * C * (2 * itemsize + 12)          # x double-buffer + f32 temporaries
        if banded:
            r += 2 * (2 * L) * L * 4                  # banded matrix double-buffer
        return r + (1 << 20)                          # weights + slack
    divisors = sorted({d for i in range(1, int(B ** 0.5) + 1) if B % i == 0
                       for d in (i, B // i)}, reverse=True)
    best = next((d for d in divisors if resident(d) <= _VMEM_BUDGET), 1)
    if best < B and best % 8 != 0:
        m8 = next((d for d in divisors if d % 8 == 0 and d <= best), None)
        if m8 is not None and 2 * m8 >= best:
            best = m8                                  # keep blocks sublane-aligned
    return best, resident(best)


# ----------------------------------------------------------------------------
# Wrapper
# ----------------------------------------------------------------------------
@functools.partial(jax.jit, static_argnames=("batch_block", "spatial_mode"))
def cbam_pallas(x, w1, w2, wsp, wfc, bfc, *, batch_block=None, spatial_mode="auto"):
    """x: (B, L, C) in its native storage dtype (f32 or bf16).
       Weights in PyTorch conventions:
         w1 : (Cr, C)   ChannelAttention fc[0]  (Conv1d C->Cr, 1x1, bias=False)
         w2 : (C, Cr)   ChannelAttention fc[2]  (Conv1d Cr->C, 1x1, bias=False)
         wsp: (2, K)    SpatialAttention conv1  (Conv1d 2->1, K taps, bias=False)
         wfc: (OUT, C), bfc: (OUT,)  final Linear."""
    B, L, C = x.shape
    OUT = wfc.shape[0]
    K = wsp.shape[1]
    assert K % 2 == 1, "padding=(K-1)//2 matches PyTorch Conv1d only for odd K"
    pad = (K - 1) // 2

    if spatial_mode == "auto":
        spatial_banded = L <= _BANDED_MAX_L
    elif spatial_mode == "banded":
        spatial_banded = True
    elif spatial_mode == "taps":
        spatial_banded = False
    else:
        raise ValueError(f"unknown spatial_mode: {spatial_mode!r}")

    if batch_block is None:
        bb, resident = _auto_batch_block(B, L, C, x.dtype.itemsize, spatial_banded)
    else:
        bb = int(batch_block)
        if bb <= 0 or B % bb != 0:
            raise ValueError(f"batch_block={batch_block} must be a positive divisor of B={B}")
        resident = bb * L * C * (2 * x.dtype.itemsize + 12) \
            + (16 * L * L if spatial_banded else 0) + (1 << 20)
    G = B // bb
    vmem_limit = int(min(48 << 20, max(32 << 20, resident + (8 << 20))))

    mlp_on_mxu = (2 * bb) >= _MLP_MXU_MIN_ROWS
    fc_on_vpu = (OUT == 1)

    # --- spatial-conv operand ---
    if spatial_banded:
        # Banded (2L, L) matrix so the K-tap conv becomes one contraction:
        #   conv = concat([avg_s, max_s], axis=1) @ M,
        #   M[j, l] = wsp[ch, j - l + pad] on the valid band, 0 elsewhere.
        jj = jnp.arange(L)[:, None]
        ll = jnp.arange(L)[None, :]
        kk = jj - ll + pad
        valid = (kk >= 0) & (kk < K)
        kc = jnp.clip(kk, 0, K - 1)
        m_avg = jnp.where(valid, wsp[0][kc], 0.0)
        m_max = jnp.where(valid, wsp[1][kc], 0.0)
        sp_oper = jnp.concatenate([m_avg, m_max], axis=0).astype(jnp.float32)   # (2L, L)
        sp_spec = pl.BlockSpec((2 * L, L), lambda i: (0, 0))
    else:
        sp_oper = wsp.reshape(2 * K).astype(jnp.float32)                        # (2K,) -> SMEM
        sp_spec = pl.BlockSpec(memory_space=pltpu.MemorySpace.SMEM)

    # --- channel-MLP / fc operands: layout picked per compute path ---
    w1_oper = (jnp.transpose(w1) if mlp_on_mxu else w1).astype(jnp.float32)     # (C,Cr)/(Cr,C)
    w2t = jnp.transpose(w2).astype(jnp.float32)                                 # (Cr, C)
    bfc2 = bfc.reshape(1, OUT).astype(jnp.float32)
    wfc_oper = (wfc.reshape(1, C) if fc_on_vpu else jnp.transpose(wfc)).astype(jnp.float32)

    def full(shape):
        zeros = (0,) * len(shape)
        return pl.BlockSpec(shape, lambda i: zeros)

    out = pl.pallas_call(
        functools.partial(_cbam_kernel, mlp_on_mxu=mlp_on_mxu,
                          spatial_banded=spatial_banded, fc_on_vpu=fc_on_vpu),
        out_shape=jax.ShapeDtypeStruct((B, OUT), jnp.float32),
        grid=(G,),
        in_specs=[
            pl.BlockSpec((bb, L, C), lambda i: (i, 0, 0)),   # native dtype, full L & C per block
            full(w1_oper.shape),
            full(w2t.shape),
            sp_spec,
            full(wfc_oper.shape),
            full((1, OUT)),
        ],
        out_specs=pl.BlockSpec((bb, OUT), lambda i: (i, 0)),
        compiler_params=pltpu.CompilerParams(
            dimension_semantics=("parallel",),
            vmem_limit_bytes=vmem_limit,
        ),
    )(x, w1_oper, w2t, sp_oper, wfc_oper, bfc2)
    return out


# ----------------------------------------------------------------------------
# Pure-JAX reference (mirrors the PyTorch forward exactly)
# ----------------------------------------------------------------------------
def cbam_ref(x, w1, w2, wsp, wfc, bfc):
    xt = jnp.transpose(x, (0, 2, 1))                        # (B, C, L)
    avg = jnp.mean(xt, axis=2)                              # (B, C)
    mx = jnp.max(xt, axis=2)

    def fc(v):
        h = jnp.maximum(v @ w1.T, 0.0)
        return h @ w2.T

    ca = jax.nn.sigmoid(fc(avg) + fc(mx))                   # (B, C)
    x_ca = xt * ca[:, :, None]                              # (B, C, L)

    avg_s = jnp.mean(x_ca, axis=1, keepdims=True)           # (B, 1, L)
    max_s = jnp.max(x_ca, axis=1, keepdims=True)            # (B, 1, L)
    inp = jnp.concatenate([avg_s, max_s], axis=1)           # (B, 2, L)
    K = wsp.shape[-1]
    conv = lax.conv_general_dilated(
        inp, wsp.reshape(1, 2, K), window_strides=(1,),
        padding=(((K - 1) // 2, (K - 1) // 2),),
        dimension_numbers=("NCH", "OIH", "NCH"))            # (B, 1, L)
    sa = jax.nn.sigmoid(conv)                               # (B, 1, L)

    x_sa = jnp.transpose(x_ca, (0, 2, 1)) * jnp.transpose(sa, (0, 2, 1))  # (B, L, C)
    pooled = jnp.mean(x_sa, axis=1)                         # (B, C)
    return jnp.maximum(pooled, 0.0) @ wfc.T + bfc           # (B, OUT)


# ----------------------------------------------------------------------------
# Main
# ----------------------------------------------------------------------------
if __name__ == "__main__":
    B, L, C = 2, 16, 128       # lane-dense channel axis (C multiple of 128)
    reduction, K, OUT = 16, 7, 1
    Cr = C // reduction        # 8

    key = jax.random.PRNGKey(0)
    k_x, k_x2, k_w1, k_w2, k_sp, k_fc = jax.random.split(key, 6)

    x = jax.random.normal(k_x, (B, L, C), dtype=jnp.float32)

    # Deterministic kaiming-normal-style init (std = sqrt(2 / fan_in)).
    w1 = jax.random.normal(k_w1, (Cr, C), jnp.float32) * jnp.sqrt(2.0 / C)
    w2 = jax.random.normal(k_w2, (C, Cr), jnp.float32) * jnp.sqrt(2.0 / Cr)
    wsp = jax.random.normal(k_sp, (2, K), jnp.float32) * jnp.sqrt(2.0 / (2 * K))
    wfc = jax.random.normal(k_fc, (OUT, C), jnp.float32) * jnp.sqrt(2.0 / C)
    bfc = jnp.zeros((OUT,), jnp.float32)

    ref = cbam_ref(x, w1, w2, wsp, wfc, bfc)

    # 1) default path: single grid step, banded spatial conv, VPU channel MLP.
    out = jax.block_until_ready(cbam_pallas(x, w1, w2, wsp, wfc, bfc))
    assert out.shape == (B, OUT), out.shape
    if not jnp.allclose(out, ref, atol=1e-4, rtol=1e-4):
        raise AssertionError(f"default path mismatch: pallas={out} ref={ref}")

    # 2) large-L spatial path (O(L*K) taps, SMEM weights) forced at the small shape.
    out_t = jax.block_until_ready(
        cbam_pallas(x, w1, w2, wsp, wfc, bfc, spatial_mode="taps"))
    if not jnp.allclose(out_t, ref, atol=1e-4, rtol=1e-4):
        raise AssertionError("taps spatial path mismatch")

    # 3) bigger batch in bf16 storage: MXU channel-MLP path + halved DMA bytes,
    #    still one grid step under the auto policy.
    B2 = 64
    x2 = jax.random.normal(k_x2, (B2, L, C), jnp.float32).astype(jnp.bfloat16)
    xf = x2.astype(jnp.float32)
    ref2 = cbam_ref(xf, w1, w2, wsp, wfc, bfc)
    out2 = jax.block_until_ready(cbam_pallas(x2, w1, w2, wsp, wfc, bfc))
    if not jnp.allclose(out2, ref2, atol=1e-3, rtol=1e-3):
        raise AssertionError("bf16 / MXU-MLP path mismatch")

    # 4) forced 2-step grid (bb=32, sublane-aligned): exercises multi-block index maps.
    out3 = jax.block_until_ready(
        cbam_pallas(xf, w1, w2, wsp, wfc, bfc, batch_block=32))
    if not jnp.allclose(out3, ref2, atol=1e-4, rtol=1e-4):
        raise AssertionError("multi-block grid mismatch")

    print("KERNEL_OK")
</pallas_src>

<mosaic_0001>
module attributes {stable_mosaic.version = 11 : i64} {
  func.func @_cbam_kernel(%arg0: i32, %arg1: memref<2x16x128xf32, #tpu.memory_space<vmem>>, %arg2: memref<8x128xf32, #tpu.memory_space<vmem>>, %arg3: memref<8x128xf32, #tpu.memory_space<vmem>>, %arg4: memref<32x16xf32, #tpu.memory_space<vmem>>, %arg5: memref<1x128xf32, #tpu.memory_space<vmem>>, %arg6: memref<1x1xf32, #tpu.memory_space<vmem>>, %arg7: memref<2x1xf32, #tpu.memory_space<vmem>>) attributes {dimension_semantics = [#tpu.dimension_semantics<parallel>], iteration_bounds = array<i64: 1>, scalar_prefetch = 0 : i64, scratch_operands = 0 : i64, tpu.core_type = #tpu.core_type<tc>, window_params = [{transform_indices = @transform_0, window_bounds = array<i64: 2, 16, 128>}, {pipeline_mode = #tpu.pipeline_mode<synchronous>, transform_indices = @transform_1, window_bounds = array<i64: 8, 128>}, {pipeline_mode = #tpu.pipeline_mode<synchronous>, transform_indices = @transform_2, window_bounds = array<i64: 8, 128>}, {pipeline_mode = #tpu.pipeline_mode<synchronous>, transform_indices = @transform_3, window_bounds = array<i64: 32, 16>}, {pipeline_mode = #tpu.pipeline_mode<synchronous>, transform_indices = @transform_4, window_bounds = array<i64: 1, 128>}, {pipeline_mode = #tpu.pipeline_mode<synchronous>, transform_indices = @transform_5, window_bounds = array<i64: 1, 1>}, {transform_indices = @transform_6, window_bounds = array<i64: 2, 1>}]} {
    %c0 = arith.constant 0 : index
    %c0_0 = arith.constant 0 : index
    %c0_1 = arith.constant 0 : index
    %0 = vector.load %arg1[%c0, %c0_0, %c0_1] : memref<2x16x128xf32, #tpu.memory_space<vmem>>, vector<2x16x128xf32>
    %cst = arith.constant 6.250000e-02 : f32
    %1 = vector.broadcast %cst : f32 to vector<2x16xf32>
    %2 = vector.shape_cast %1 : vector<2x16xf32> to vector<2x1x16xf32>
    %cst_2 = arith.constant dense<0.000000e+00> : vector<2x1x128xf32>
    %3 = tpu.matmul %2, %0, %cst_2 {dimension_numbers = #tpu.dot_dimension_numbers<[2], [1], [1], [2], [0, 0, 0, 1, 1, 2], [0], [0]>} : vector<2x1x16xf32>, vector<2x16x128xf32>, vector<2x1x128xf32> -> vector<2x1x128xf32>
    %4 = vector.shape_cast %3 : vector<2x1x128xf32> to vector<2x128xf32>
    %cst_3 = arith.constant dense<0xFF800000> : vector<2x128xf32>
    %5 = vector.multi_reduction <maximumf>, %0, %cst_3 [1] : vector<2x16x128xf32> to vector<2x128xf32>
    %6 = tpu.concatenate %4, %5 in 0 : vector<2x128xf32>, vector<2x128xf32> -> vector<4x128xf32>
    %7 = vector.shape_cast %6 : vector<4x128xf32> to vector<4x1x128xf32>
    %c0_4 = arith.constant 0 : index
    %c0_5 = arith.constant 0 : index
    %8 = vector.load %arg2[%c0_4, %c0_5] : memref<8x128xf32, #tpu.memory_space<vmem>>, vector<8x128xf32>
    %9 = vector.shape_cast %8 : vector<8x128xf32> to vector<1x8x128xf32>
    %10 = vector.broadcast %7 : vector<4x1x128xf32> to vector<4x8x128xf32>
    %11 = vector.broadcast %9 : vector<1x8x128xf32> to vector<4x8x128xf32>
    %12 = arith.mulf %10, %11 : vector<4x8x128xf32>
    %cst_6 = arith.constant dense<0.000000e+00> : vector<4x8xf32>
    %13 = vector.multi_reduction <add>, %12, %cst_6 [2] : vector<4x8x128xf32> to vector<4x8xf32>
    %cst_7 = arith.constant 0.000000e+00 : f32
    %14 = vector.broadcast %cst_7 : f32 to vector<4x8xf32>
    %15 = arith.maximumf %13, %14 : vector<4x8xf32>
    %16 = vector.shape_cast %15 : vector<4x8xf32> to vector<4x8x1xf32>
    %c0_8 = arith.constant 0 : index
    %c0_9 = arith.constant 0 : index
    %17 = vector.load %arg3[%c0_8, %c0_9] : memref<8x128xf32, #tpu.memory_space<vmem>>, vector<8x128xf32>
    %18 = vector.shape_cast %17 : vector<8x128xf32> to vector<1x8x128xf32>
    %19 = vector.broadcast %16 : vector<4x8x1xf32> to vector<4x8x128xf32>
    %20 = vector.broadcast %18 : vector<1x8x128xf32> to vector<4x8x128xf32>
    %21 = arith.mulf %19, %20 : vector<4x8x128xf32>
    %cst_10 = arith.constant dense<0.000000e+00> : vector<4x128xf32>
    %22 = vector.multi_reduction <add>, %21, %cst_10 [1] : vector<4x8x128xf32> to vector<4x128xf32>
    %23 = vector.extract_strided_slice %22 {offsets = [0, 0], sizes = [2, 128], strides = [1, 1]} : vector<4x128xf32> to vector<2x128xf32>
    %24 = vector.extract_strided_slice %22 {offsets = [2, 0], sizes = [2, 128], strides = [1, 1]} : vector<4x128xf32> to vector<2x128xf32>
    %25 = arith.addf %23, %24 : vector<2x128xf32>
    %26 = arith.negf %25 : vector<2x128xf32>
    %27 = math.exp %26 : vector<2x128xf32>
    %cst_11 = arith.constant 1.000000e+00 : f32
    %28 = vector.broadcast %cst_11 : f32 to vector<2x128xf32>
    %29 = arith.addf %28, %27 : vector<2x128xf32>
    %30 = arith.divf %28, %29 : vector<2x128xf32>
    %31 = vector.shape_cast %30 : vector<2x128xf32> to vector<2x1x128xf32>
    %32 = vector.broadcast %31 : vector<2x1x128xf32> to vector<2x16x128xf32>
    %33 = arith.mulf %0, %32 : vector<2x16x128xf32>
    %cst_12 = arith.constant dense<0.000000e+00> : vector<2x16xf32>
    %34 = vector.multi_reduction <add>, %33, %cst_12 [2] : vector<2x16x128xf32> to vector<2x16xf32>
    %cst_13 = arith.constant 1.280000e+02 : f32
    %35 = vector.broadcast %cst_13 : f32 to vector<2x16xf32>
    %36 = arith.divf %34, %35 : vector<2x16xf32>
    %cst_14 = arith.constant dense<0xFF800000> : vector<2x16xf32>
    %37 = vector.multi_reduction <maximumf>, %33, %cst_14 [2] : vector<2x16x128xf32> to vector<2x16xf32>
    %38 = tpu.concatenate %36, %37 in 1 : vector<2x16xf32>, vector<2x16xf32> -> vector<2x32xf32>
    %c0_15 = arith.constant 0 : index
    %c0_16 = arith.constant 0 : index
    %39 = vector.load %arg4[%c0_15, %c0_16] : memref<32x16xf32, #tpu.memory_space<vmem>>, vector<32x16xf32>
    %cst_17 = arith.constant dense<0.000000e+00> : vector<2x16xf32>
    %40 = tpu.matmul %38, %39, %cst_17 {dimension_numbers = #tpu.dot_dimension_numbers<[1], [0], [0], [1], [0, 0, 1, 1], [], []>} : vector<2x32xf32>, vector<32x16xf32>, vector<2x16xf32> -> vector<2x16xf32>
    %41 = arith.negf %40 : vector<2x16xf32>
    %42 = math.exp %41 : vector<2x16xf32>
    %cst_18 = arith.constant 1.000000e+00 : f32
    %43 = vector.broadcast %cst_18 : f32 to vector<2x16xf32>
    %44 = arith.addf %43, %42 : vector<2x16xf32>
    %45 = arith.divf %43, %44 : vector<2x16xf32>
    %cst_19 = arith.constant 6.250000e-02 : f32
    %46 = vector.broadcast %cst_19 : f32 to vector<2x16xf32>
    %47 = arith.mulf %45, %46 : vector<2x16xf32>
    %48 = vector.shape_cast %47 : vector<2x16xf32> to vector<2x1x16xf32>
    %cst_20 = arith.constant dense<0.000000e+00> : vector<2x1x128xf32>
    %49 = tpu.matmul %48, %33, %cst_20 {dimension_numbers = #tpu.dot_dimension_numbers<[2], [1], [1], [2], [0, 0, 0, 1, 1, 2], [0], [0]>} : vector<2x1x16xf32>, vector<2x16x128xf32>, vector<2x1x128xf32> -> vector<2x1x128xf32>
    %50 = vector.shape_cast %49 : vector<2x1x128xf32> to vector<2x128xf32>
    %cst_21 = arith.constant 0.000000e+00 : f32
    %51 = vector.broadcast %cst_21 : f32 to vector<2x128xf32>
    %52 = arith.maximumf %50, %51 : vector<2x128xf32>
    %c0_22 = arith.constant 0 : index
    %c0_23 = arith.constant 0 : index
    %53 = vector.load %arg5[%c0_22, %c0_23] : memref<1x128xf32, #tpu.memory_space<vmem>>, vector<1x128xf32>
    %54 = vector.broadcast %53 : vector<1x128xf32> to vector<2x128xf32>
    %55 = arith.mulf %52, %54 : vector<2x128xf32>
    %cst_24 = arith.constant dense<0.000000e+00> : vector<2xf32>
    %56 = vector.multi_reduction <add>, %55, %cst_24 [1] : vector<2x128xf32> to vector<2xf32>
    %57 = vector.shape_cast %56 : vector<2xf32> to vector<2x1xf32>
    %c0_25 = arith.constant 0 : index
    %c0_26 = arith.constant 0 : index
    %58 = vector.load %arg6[%c0_25, %c0_26] : memref<1x1xf32, #tpu.memory_space<vmem>>, vector<1x1xf32>
    %59 = vector.broadcast %58 : vector<1x1xf32> to vector<2x1xf32>
    %60 = arith.addf %57, %59 : vector<2x1xf32>
    %c0_27 = arith.constant 0 : index
    %c0_28 = arith.constant 0 : index
    %61 = vector.load %arg7[%c0_27, %c0_28] : memref<2x1xf32, #tpu.memory_space<vmem>>, vector<2x1xf32>
    tpu.vector_store %arg7[%c0_27, %c0_28], %60 {strides = array<i32>} : memref<2x1xf32, #tpu.memory_space<vmem>>, vector<2x1xf32>,
    return
  }
  func.func @transform_0(%arg0: i32) -> (i32, i32, i32) {
    %c0_i32 = arith.constant 0 : i32
    %c0_i32_0 = arith.constant 0 : i32
    %c0_i32_1 = arith.constant 0 : i32
    return %arg0, %c0_i32, %c0_i32_0 : i32, i32, i32
  }
  func.func @transform_1(%arg0: i32) -> (i32, i32) {
    %c0_i32 = arith.constant 0 : i32
    %c0_i32_0 = arith.constant 0 : i32
    %c0_i32_1 = arith.constant 0 : i32
    return %c0_i32, %c0_i32_0 : i32, i32
  }
  func.func @transform_2(%arg0: i32) -> (i32, i32) {
    %c0_i32 = arith.constant 0 : i32
    %c0_i32_0 = arith.constant 0 : i32
    %c0_i32_1 = arith.constant 0 : i32
    return %c0_i32, %c0_i32_0 : i32, i32
  }
  func.func @transform_3(%arg0: i32) -> (i32, i32) {
    %c0_i32 = arith.constant 0 : i32
    %c0_i32_0 = arith.constant 0 : i32
    %c0_i32_1 = arith.constant 0 : i32
    return %c0_i32, %c0_i32_0 : i32, i32
  }
  func.func @transform_4(%arg0: i32) -> (i32, i32) {
    %c0_i32 = arith.constant 0 : i32
    %c0_i32_0 = arith.constant 0 : i32
    %c0_i32_1 = arith.constant 0 : i32
    return %c0_i32, %c0_i32_0 : i32, i32
  }
  func.func @transform_5(%arg0: i32) -> (i32, i32) {
    %c0_i32 = arith.constant 0 : i32
    %c0_i32_0 = arith.constant 0 : i32
    %c0_i32_1 = arith.constant 0 : i32
    return %c0_i32, %c0_i32_0 : i32, i32
  }
  func.func @transform_6(%arg0: i32) -> (i32, i32) {
    %c0_i32 = arith.constant 0 : i32
    %c0_i32_0 = arith.constant 0 : i32
    return %arg0, %c0_i32 : i32, i32
  }
}

</mosaic_0001>

<bundles_post_ra>
// kernel: cbam_pallas.1
= control target key start
LH: loop header
LB: loop body
LE: loop exit
PB: predicated region body
PF: predicated region fallthrough
CT: control target
= control target key end

     0   :  { %v753_v0 = vmov 0.0   ;;  %vm29_vm0 = vcmask 130048   ;;  %vm754_vm1 = vmmov 0   ;;  %v755_v5 = vmov 0.0625   ;;  %s912_s0 = inlined_call_operand.vmem [shape: f32[2,16,128], index: 0, kind: input, shape index: {}]   ;;  %s913_s1 = inlined_call_operand.vmem [shape: f32[8,128], index: 1, kind: input, shape index: {}]   ;;  %s914_s2 = inlined_call_operand.vmem [shape: f32[8,128], index: 2, kind: input, shape index: {}]   ;;  %s915_s3 = inlined_call_operand.vmem [shape: f32[32,16], index: 3, kind: input, shape index: {}]   ;;  %s916_s5 = inlined_call_operand.<no memory space> [shape: f32[1,1], index: 5, kind: input, shape index: {}]   ;;  %s917_s4 = inlined_call_operand.vmem [shape: f32[1,128], index: 4, kind: input, shape index: {}]   ;;  %s918_s6 = inlined_call_operand.vmem [shape: f32[2,1], index: 6, kind: output, shape index: {}]  }
   0x1   :  { %698 = vmatprep.subr.mxu0 %v753_v0  ;;  %705 = vmatprep.subr.mxu1 %v753_v0  ;;  %v797_v1 = vld [vmem:[%s912_s0 + $0x8] sm:$0xff]  ;;  %v802_v2 = vld [vmem:[%s912_s0 + $0x18] sm:$0xff]  ;;  %v807_v3 = vld [vmem:[%s912_s0] sm:$0xff]  ;;  %v756_v18 = vmov 1966171168   ;;  %v204_v20 = vlaneseq  ;;  %vm195_vm2 = vcmask 1043459  }
   0x2   :  { %699 = vmatpush3.msra.mxu0 %v797_v1  ;;  %706 = vmatpush3.msra.mxu1 %v802_v2  ;;  %v814_v4 = vld [vmem:[%s912_s0 + $0x10] sm:$0xff]  ;;  %v173_v6 = vmax.f32 %v807_v3, %v797_v1  ;;  %v202_v19 = vunpack.c.l.s4 %v756_v18  ;;  %vm190_vm3 = vcmask 1041409   ;;  %vm198_vm4 = vcmask 1041408   ;;  %v225_v38 = vld [vmem:[%s913_s1] sm:$0xff] }
   0x3   :  { %700 = vmatprep.subr.mxu0 %v753_v0  ;;  %707 = vmatprep.subr.mxu1 %v753_v0  ;;  %v180_v7 = vmax.f32 %v814_v4, %v802_v2  ;;  %v837_v24 = vshrl.u32 %v204_v20, 7  ;;  %v262_v50 = vld [vmem:[%s914_s2] sm:$0xff]  ;;  %vm345_vm5 = vcmask 130112   ;;  %vm372_vm6 = vcmask 261312  }
   0x4   :  { %701 = vmatpush3.msra.mxu0 %v807_v3  ;;  %702 = vmatprep.mubr.msk.f32.mxu0 %vm754_vm1, %v753_v0  ;;  %v174_v8 = vrot.slane %v173_v6, 4  ;;  %v203_v23 = vunpack.c.0.s8 %v202_v19  ;;  %vm390_vm7 = vcmask 261120   ;;  %vm665_vm8 = vcmask 1024  }
   0x5   :  { %708 = vmatpush3.msra.mxu1 %v814_v4  ;;  %709 = vmatprep.mubr.msk.f32.mxu1 %vm754_vm1, %v753_v0  ;;  %v181_v9 = vrot.slane %v180_v7, 4  ;;  %v228_v35 = vsub.s32 0, %v837_v24 }
   0x6   :  { %703 = vmatmul.mubr.msk.f32.vlgmr.msra.gmra.mxu0 %vm29_vm0, %v755_v5  ;;  %710 = vmatmul.mubr.msk.f32.vlgmr.msra.gmra.mxu1 %vm29_vm0, %v755_v5  ;;  %v175_v10 = vmax.f32 %v173_v6, %v174_v8  ;;  %v840_v29 = vsub.s32 %v203_v23, %v837_v24 }
   0x7   :  { %723 = vmatprep.subr.mxu1 %v753_v0  ;;  %712 = vmatprep.subr.mxu0 %v753_v0  ;;  %v182_v11 = vmax.f32 %v180_v7, %v181_v9 }
   0x8   :  { %720 = vmatprep.mubr.msk.f32.mxu0 %vm754_vm1, %v753_v0  ;;  %727 = vmatprep.mubr.msk.f32.mxu1 %vm754_vm1, %v753_v0  ;;  %v176_v12 = vrot.slane %v175_v10, 2 }
   0x9   :  { %v183_v13 = vrot.slane %v182_v11, 2 }
   0xa   :  { %v177_v14 = vmax.f32 %v175_v10, %v176_v12 }
   0xb   :  { %v184_v15 = vmax.f32 %v182_v11, %v183_v13 }
   0xc   :  { %v178_v16 = vrot.slane %v177_v14, 1 }
   0xd   :  { %v185_v17 = vrot.slane %v184_v15, 1 }
   0xe   :  { %v179_v21 = vmax.f32 %v177_v14, %v178_v16 }
   0xf   :  { %v186_v22 = vmax.f32 %v184_v15, %v185_v17 }
  0x11   :  { %v196_v28 = vsel %vm195_vm2, %v186_v22, %v179_v21 }
  0xc6   :  { %v99_v25 = vpop.f32.mrf.mxu0  ;;  %v169_v26 = vpop.f32.mrf.mxu1 }
  0xc7   :  { %v189_v27 = vrot.slane %v169_v26, 7 }
  0xc8   :  { %v704_v30 = vpop.f32.mrf.mxu0  ;;  %v711_v31 = vpop.f32.mrf.mxu1 }
  0xc9   :  { %v191_v32 = vsel %vm190_vm3, %v189_v27, %v99_v25 }
  0xca   :  { %v199_v33 = vsel %vm198_vm4, %v191_v32, %v196_v28 }
  0xcb   :  { %v207_v34 = vrot.slane %v199_v33, %v840_v29 }
  0xcd   :  { %v215_v36 = vrot.slane %v207_v34, %v840_v29  ;;  %v208_v37 = vcombine.high %v207_v34, %v207_v34 }
  0xcf   :  { %v229_v39 = vrot.slane %v215_v36, %v228_v35  ;;  %v223_v40 = vcombine.high %v215_v36, %v215_v36  ;;  %v222_v41 = vrot.slane %v208_v37, %v840_v29 }
  0xd1   :  { %v246_v42 = vmul.f32 %v229_v39, %v225_v38  ;;  %v237_v43 = vrot.slane %v223_v40, %v228_v35  ;;  %v233_v44 = vrot.slane %v222_v41, %v228_v35  ;;  %v224_v45 = vcombine.high %v222_v41, %v222_v41 }
  0xd3   :  { %250 = vadd.xlane.f32.xlu0 %v246_v42  ;;  %v248_v46 = vmul.f32 %v237_v43, %v225_v38  ;;  %v241_v47 = vrot.slane %v224_v45, %v228_v35  ;;  %v247_v48 = vmul.f32 %v233_v44, %v225_v38  ;;  %v335_v45 = vand.u32 127, %v204_v20 }
  0xd5   :  { %254 = vadd.xlane.f32.xlu1 %v248_v46  ;;  %v249_v49 = vmul.f32 %v241_v47, %v225_v38 }
  0xd7   :  { %252 = vadd.xlane.f32.xlu0 %v247_v48  ;;  %v340_v48 = vadd.s32 4294967288, %v335_v45 }
  0xd9   :  { %256 = vadd.xlane.f32.xlu1 %v249_v49  ;;  %v362_v49 = vadd.s32 4294967280, %v335_v45 }
 0x15c   :  { %v251_v51 = vpop.xlane.xlu0 %250 }
 0x15d   :  { %v258_v52 = vmax.f32 %v251_v51, 0.0  ;;  %v367_v51 = vadd.s32 4294967272, %v335_v45 }
 0x15e   :  { %v255_v53 = vpop.xlane.xlu1 %254 }
 0x15f   :  { %v263_v54 = vmul.f32 %v262_v50, %v258_v52  ;;  %v260_v55 = vmax.f32 %v255_v53, 0.0  ;;  %v338_v53 = vsub.s32 %v335_v45, %v837_v24 }
 0x160   :  { %v253_v56 = vpop.xlane.xlu0 %252 }
 0x161   :  { %v267_v57 = vrot.slane %v263_v54, 4  ;;  %v265_v58 = vmul.f32 %v262_v50, %v260_v55  ;;  %v259_v59 = vmax.f32 %v253_v56, 0.0  ;;  %v343_v55 = vsub.s32 %v340_v48, %v837_v24 }
 0x162   :  { %v257_v60 = vpop.xlane.xlu1 %256 }
 0x163   :  { %v268_v61 = vadd.f32 %v267_v57, %v263_v54  ;;  %v279_v62 = vrot.slane %v265_v58, 4  ;;  %v264_v63 = vmul.f32 %v262_v50, %v259_v59  ;;  %v261_v5 = vmax.f32 %v257_v60, 0.0 }
 0x164   :  { %v365_v57 = vsub.s32 %v362_v49, %v837_v24 }
 0x165   :  { %v269_v6 = vrot.slane %v268_v61, 2  ;;  %v280_v7 = vadd.f32 %v279_v62, %v265_v58  ;;  %v273_v8 = vrot.slane %v264_v63, 4  ;;  %v266_v9 = vmul.f32 %v262_v50, %v261_v5 }
 0x166   :  { %v370_v58 = vsub.s32 %v367_v51, %v837_v24 }
 0x167   :  { %v270_v10 = vadd.f32 %v269_v6, %v268_v61  ;;  %v281_v11 = vrot.slane %v280_v7, 2  ;;  %v274_v12 = vadd.f32 %v273_v8, %v264_v63  ;;  %v285_v13 = vrot.slane %v266_v9, 4 }
 0x169   :  { %v271_v14 = vrot.slane %v270_v10, 1  ;;  %v282_v15 = vadd.f32 %v281_v11, %v280_v7  ;;  %v275_v16 = vrot.slane %v274_v12, 2  ;;  %v286_v17 = vadd.f32 %v285_v13, %v266_v9 }
 0x16b   :  { %v283_v18 = vrot.slane %v282_v15, 1  ;;  %v276_v19 = vadd.f32 %v275_v16, %v274_v12  ;;  %v287_v21 = vrot.slane %v286_v17, 2  ;;  %v272_v22 = vadd.f32 %v271_v14, %v270_v10 }
 0x16d   :  { %v284_v23 = vadd.f32 %v283_v18, %v282_v15  ;;  %v277_v25 = vrot.slane %v276_v19, 1  ;;  %v288_v26 = vadd.f32 %v287_v21, %v286_v17 }
 0x16f   :  { %v291_v27 = vadd.f32 %v284_v23, %v272_v22  ;;  %v289_v28 = vrot.slane %v288_v26, 1  ;;  %v278_v31 = vadd.f32 %v277_v25, %v276_v19 }
 0x171   :  { %v673_v30 = vmul.f32 -1.442695, %v291_v27  ;;  %v290_v32 = vadd.f32 %v289_v28, %v288_v26 }
 0x173   :  { %741 = vpow2.f32 %v673_v30  ;;  %v292_v33 = vadd.f32 %v290_v32, %v278_v31 }
 0x175   :  { %v674_v34 = vmul.f32 -1.442695, %v292_v33  ;;  %v11_v33 = vstv %s916_s5 }
 0x176   :  { %12 = vst [vmem:[#allocation2] sm:$0x1] %v11_v33 }
 0x177   :  { %743 = vpow2.f32 %v674_v34 }
 0x180   :  { %v742_v35 = vpop.eup %741 }
 0x181   :  { %v299_v36 = vadd.f32 1.0, %v742_v35 }
 0x183   :  { %745 = vrcp.f32 %v299_v36 }
 0x184   :  { %v744_v37 = vpop.eup %743 }
 0x185   :  { %v300_v38 = vadd.f32 1.0, %v744_v37 }
 0x187   :  { %747 = vrcp.f32 %v300_v38 }
 0x190   :  { %v746_v39 = vpop.eup %745 }
 0x191   :  { %v306_v40 = vmul.f32 %v746_v39, %v797_v1  ;;  %v305_v41 = vmul.f32 %v746_v39, %v807_v3  ;;  %v389_v1 = vld [vmem:[%s915_s3 + $0x18] sm:$0xff]  ;;  %v387_v3 = vld [vmem:[%s915_s3 + $0x8] sm:$0xff] }
 0x192   :  { %713 = vmatpush3.msra.mxu0 %v389_v1 }
 0x193   :  { %724 = vmatpush3.msra.mxu1 %v306_v40  ;;  %309 = vadd.xlane.f32.xlu0 %v305_v41 }
 0x194   :  { %311 = vadd.xlane.f32.xlu1 %v306_v40  ;;  %725 = vmatprep.subr.mxu1 %v753_v0  ;;  %v748_v42 = vpop.eup %747 }
 0x195   :  { %726 = vmatpush3.msra.mxu1 %v305_v41  ;;  %v859_v43 = vmul.f32 %v748_v42, %v814_v4  ;;  %v862_v44 = vmul.f32 %v748_v42, %v802_v2  ;;  %714 = vmatprep.subr.mxu0 %v753_v0  ;;  %v388_v2 = vld [vmem:[%s915_s3 + $0x10] sm:$0xff]  ;;  %v386_v4 = vld [vmem:[%s915_s3] sm:$0xff] }
 0x196   :  { %730 = vmatprep.subr.mxu1 %v753_v0  ;;  %715 = vmatpush3.msra.mxu0 %v388_v2 }
 0x197   :  { %322 = vmax.xlane.f32.xlu0 %v305_v41  ;;  %716 = vmatprep.subr.mxu0 %v753_v0 }
 0x198   :  { %324 = vmax.xlane.f32.xlu1 %v306_v40  ;;  %717 = vmatpush3.msra.mxu0 %v387_v3 }
 0x199   :  { %718 = vmatprep.subr.mxu0 %v753_v0 }
 0x19a   :  { %719 = vmatpush3.msra.mxu0 %v386_v4 }
 0x19b   :  { %313 = vadd.xlane.f32.xlu0 %v859_v43 }
 0x19c   :  { %315 = vadd.xlane.f32.xlu1 %v862_v44 }
 0x19f   :  { %326 = vmax.xlane.f32.xlu0 %v859_v43 }
 0x1a0   :  { %328 = vmax.xlane.f32.xlu1 %v862_v44 }
 0x21c   :  { %v310_v46 = vpop.xlane.xlu0 %309 }
 0x21d   :  { %v312_v47 = vpop.xlane.xlu1 %311  ;;  %v318_v54 = vmul.f32 0.0078125, %v310_v46 }
 0x21e   :  { %v319_v56 = vmul.f32 0.0078125, %v312_v47 }
 0x21f   :  { %v339_v62 = vrot.slane %v318_v54, %v338_v53 }
 0x220   :  { %v323_v50 = vpop.xlane.xlu0 %322  ;;  %v344_v5 = vrot.slane %v319_v56, %v343_v55 }
 0x221   :  { %v325_v52 = vpop.xlane.xlu1 %324  ;;  %v366_v6 = vrot.slane %v323_v50, %v365_v57 }
 0x222   :  { %v371_v7 = vrot.slane %v325_v52, %v370_v58  ;;  %v346_v14 = vsel %vm345_vm5, %v344_v5, %v339_v62 }
 0x224   :  { %v314_v59 = vpop.xlane.xlu0 %313  ;;  %v373_v15 = vsel %vm372_vm6, %v371_v7, %v366_v6 }
 0x225   :  { %v320_v60 = vmul.f32 0.0078125, %v314_v59  ;;  %v316_v20 = vpop.xlane.xlu1 %315 }
 0x226   :  { %v321_v61 = vmul.f32 0.0078125, %v316_v20 }
 0x227   :  { %v350_v63 = vrot.slane %v320_v60, %v338_v53 }
 0x228   :  { %v354_v8 = vrot.slane %v321_v61, %v343_v55  ;;  %v327_v9 = vpop.xlane.xlu0 %326 }
 0x229   :  { %v377_v10 = vrot.slane %v327_v9, %v365_v57  ;;  %v329_v11 = vpop.xlane.xlu1 %328 }
 0x22a   :  { %v355_v12 = vsel %vm345_vm5, %v354_v8, %v350_v63  ;;  %v381_v13 = vrot.slane %v329_v11, %v370_v58 }
 0x22b   :  { %v356_v17 = vsel %vm190_vm3, %v355_v12, %v346_v14 }
 0x22c   :  { %v382_v24 = vsel %vm372_vm6, %v381_v13, %v377_v10 }
 0x22d   :  { %v383_v16 = vsel %vm190_vm3, %v382_v24, %v373_v15 }
 0x22e   :  { %v385_v18 = vsel %vm29_vm0, %v356_v17, %v383_v16 }
 0x22f   :  { %721 = vmatmul.mubr.msk.f32.vlgmr.msra.gmra.mxu0 %vm390_vm7, %v385_v18 }
 0x2ef   :  { %v460_v19 = vpop.f32.mrf.mxu0 }
 0x2f0   :  { %v676_v21 = vmul.f32 -1.442695, %v460_v19 }
 0x2f1   :  { %v722_v22 = vpop.f32.mrf.mxu0 }
 0x2f2   :  { %749 = vpow2.f32 %v676_v21 }
 0x2ff   :  { %v750_v23 = vpop.eup %749 }
 0x300   :  { %v467_v25 = vadd.f32 1.0, %v750_v23 }
 0x302   :  { %751 = vrcp.f32 %v467_v25 }
 0x30f   :  { %v752_v26 = vpop.eup %751 }
 0x310   :  { %v470_v27 = vmul.f32 0.0625, %v752_v26 }
 0x312   :  { %v478_v28 = vrot.slane %v470_v27, %v840_v29 }
 0x314   :  { %v479_v30 = vcombine.high %v478_v28, %v478_v28  ;;  %v486_v31 = vrot.slane %v478_v28, %v840_v29 }
 0x316   :  { %728 = vmatmul.mubr.msk.f32.vlgmr.msra.gmra.mxu1 %vm29_vm0, %v486_v31  ;;  %v493_v32 = vrot.slane %v479_v30, %v840_v29 }
 0x317   :  { %731 = vmatpush3.msra.mxu1 %v862_v44  ;;  %734 = vmatprep.mubr.msk.f32.mxu1 %vm754_vm1, %v753_v0  ;;  %v680_v44 = vld [vmem:[#allocation2] ss:$0 sm:$0xff] }
 0x318   :  { %732 = vmatprep.subr.mxu1 %v753_v0  ;;  %v679_v0 = vld [vmem:[%s917_s4] ss:$0 sm:$0xff] }
 0x319   :  { %733 = vmatpush3.msra.mxu1 %v859_v43 }
 0x31a   :  { %735 = vmatmul.mubr.msk.f32.vlgmr.msra.gmra.mxu1 %vm29_vm0, %v493_v32 }
 0x3d6   :  { %v562_v34 = vpop.f32.mrf.mxu1 }
 0x3d7   :  { %v638_v37 = vmax.f32 %v562_v34, 0.0 }
 0x3d8   :  { %v729_v35 = vpop.f32.mrf.mxu1 }
 0x3d9   :  { %v647_v40 = vmul.f32 %v679_v0, %v638_v37 }
 0x3da   :  { %v634_v36 = vpop.f32.mrf.mxu1 }
 0x3db   :  { %v639_v38 = vmax.f32 %v634_v36, 0.0 }
 0x3dc   :  { %v736_v39 = vpop.f32.mrf.mxu1 }
 0x3dd   :  { %v648_v29 = vmul.f32 %v679_v0, %v639_v38 }
 0x3df   :  { %v651_v41 = vrot.slane %v648_v29, 7 }
 0x3e1   :  { %v652_v42 = vsel %vm190_vm3, %v651_v41, %v647_v40 }
 0x3e2   :  { %v654_v43 = vsel %vm198_vm4, %v652_v42, 0.0 }
 0x3e3   :  { %655 = vadd.xlane.f32.xlu0 %v654_v43 }
 0x46c   :  { %v656_v1 = vpop.xlane.xlu0 %655 }
 0x46d   :  { %v664_v2 = vadd.f32 %v680_v44, %v656_v1 }
 0x46f   :  { %666 = vst.msk [vmem:[%s918_s6] sm:$0x3] %vm665_vm8, %v664_v2 }

</bundles_post_ra>
